<compile_context>
chip_gen: v7x
topology: tpu7x:2x2x1
jax: 0.10.0
libtpu: 0.0.40
codegen_flags: <defaults>
</compile_context>

<pallas_src>
import jax
import jax.numpy as jnp
from jax.experimental import pallas as pl
from jax.experimental.pallas import tpu as pltpu


def se_block_kernel(x_ref, w1_ref, b1_ref, w2_ref, b2_ref, o_ref):
    # x_ref: (TB, C, F*T) tile in VMEM; weights/biases are fully resident.

    # --- squeeze: global average pool over the spatial (lane) axis ----------
    pooled = jnp.mean(x_ref[...].astype(jnp.float32), axis=-1)          # (TB, C)

    # --- excitation: Linear(C -> C//8) + ReLU --------------------------------
    h = jnp.dot(pooled, w1_ref[...],
                preferred_element_type=jnp.float32) + b1_ref[...]       # (TB, C//8)
    h = jnp.maximum(h, 0.0)

    # --- Linear(C//8 -> C) + Sigmoid (EUP logistic path) ---------------------
    s = jnp.dot(h, w2_ref[...],
                preferred_element_type=jnp.float32) + b2_ref[...]       # (TB, C)
    s = jax.nn.sigmoid(s)

    # --- scale: broadcast channel gate; multiply in f32, downcast on store ---
    o_ref[...] = (x_ref[...].astype(jnp.float32) * s[:, :, None]).astype(o_ref.dtype)


def _vmem_capacity_bytes():
    """Per-core VMEM capacity; conservative 64 MiB fallback (v7x) off-TPU."""
    try:
        return int(pltpu.get_tpu_info().vmem_capacity_bytes)
    except Exception:
        return 64 * 1024 * 1024


def _pick_batch_tile(b, c, ft, itemsize, vmem_cap):
    """Batch tile sized so 4 double-buffered in+out tiles use ~half of VMEM."""
    row_bytes = c * ft * itemsize
    tile_budget = vmem_cap // 8                 # one tile; x4 for dbl-buffered in+out
    tb = max(1, tile_budget // row_bytes)       # no artificial floor; 1 is legal
    if b >= 4:
        # >=2 grid steps per TensorCore so v7x megacore sharding has work.
        tb = min(tb, pl.cdiv(b, 4))
    return int(min(tb, b))


def se_block_2d(x, w1_t, b1, w2_t, b2, *, tb=None, in_place=False):
    """x: (b, c, f, t); w1_t: (c, c//8); b1: (1, c//8); w2_t: (c//8, c); b2: (1, c)."""
    b, c, f, t = x.shape
    ft = f * t
    se = w1_t.shape[1]
    x3 = x.reshape(b, c, ft)
    itemsize = jnp.dtype(x.dtype).itemsize

    vmem_cap = _vmem_capacity_bytes()
    if tb is None:
        tb = _pick_batch_tile(b, c, ft, itemsize, vmem_cap)
    tb = max(1, min(int(tb), b))

    param_bytes = 4 * (w1_t.size + b1.size + w2_t.size + b2.size)
    row_bytes = c * ft * itemsize
    cap_limit = int(0.75 * vmem_cap)
    if 4 * row_bytes + param_bytes + (4 << 20) > cap_limit:
        # TODO(synk): add spatial (f*t) tiling for extremely large single rows.
        raise ValueError("one batch row does not fit the VMEM budget; "
                         "spatial tiling is not implemented")

    tile_bytes = tb * row_bytes
    vmem_limit = min(cap_limit, max(16 << 20, 4 * tile_bytes + param_bytes + (4 << 20)))

    extra = {"input_output_aliases": {0: 0}} if in_place else {}

    out = pl.pallas_call(
        se_block_kernel,
        out_shape=jax.ShapeDtypeStruct((b, c, ft), x.dtype),
        grid_spec=pltpu.PrefetchScalarGridSpec(
            num_scalar_prefetch=0,
            grid=(pl.cdiv(b, tb),),
            in_specs=[
                # batch-tiled activations
                pl.BlockSpec((tb, c, ft), lambda i: (i, 0, 0)),
                # parameters: constant block index -> stay resident in VMEM
                pl.BlockSpec((c, se), lambda i: (0, 0)),   # W1^T
                pl.BlockSpec((1, se), lambda i: (0, 0)),   # b1
                pl.BlockSpec((se, c), lambda i: (0, 0)),   # W2^T
                pl.BlockSpec((1, c), lambda i: (0, 0)),    # b2
            ],
            out_specs=pl.BlockSpec((tb, c, ft), lambda i: (i, 0, 0)),
        ),
        compiler_params=pltpu.CompilerParams(
            dimension_semantics=("parallel",),
            vmem_limit_bytes=int(vmem_limit),
        ),
        **extra,
    )(x3,
      w1_t.astype(jnp.float32), b1.astype(jnp.float32),
      w2_t.astype(jnp.float32), b2.astype(jnp.float32))

    return out.reshape(b, c, f, t)


def _reference(x, w1_t, b1, w2_t, b2):
    """Pure-JAX reference mirroring the PyTorch forward (f32 math)."""
    x32 = x.astype(jnp.float32)
    pooled = jnp.mean(x32, axis=(2, 3))
    h = jnp.maximum(pooled @ w1_t + b1, 0.0)
    s = jax.nn.sigmoid(h @ w2_t + b2)
    return x32 * s[:, :, None, None]


if __name__ == "__main__":
    # Channel dim is forced to 40 by the module's hard-coded Linear(40, 5).
    C, F, T = 40, 16, 16
    SE = C // 8  # 5

    key = jax.random.PRNGKey(0)
    kx, kw1, kb1, kw2, kb2, kx2 = jax.random.split(key, 6)

    # PyTorch Linear weight is (out, in); we store the transpose so the kernel
    # does a plain row-major matmul on the MXU.
    w1_t = jax.random.normal(kw1, (C, SE), dtype=jnp.float32) * 0.1   # (40, 5)
    b1 = jax.random.normal(kb1, (1, SE), dtype=jnp.float32) * 0.1     # (1, 5)
    w2_t = jax.random.normal(kw2, (SE, C), dtype=jnp.float32) * 0.1   # (5, 40)
    b2 = jax.random.normal(kb2, (1, C), dtype=jnp.float32) * 0.1      # (1, 40)

    # --- test 1: f32, small batch, auto tile --------------------------------
    B = 2
    x = jax.random.normal(kx, (B, C, F, T), dtype=jnp.float32)
    ref = _reference(x, w1_t, b1[0], w2_t, b2[0])
    out = jax.block_until_ready(se_block_2d(x, w1_t, b1, w2_t, b2))
    assert out.shape == (B, C, F, T)
    assert jnp.allclose(out, ref, atol=1e-5, rtol=1e-5), "f32 mismatch vs reference"

    # --- test 2: non-divisible batch (padded last block must stay benign) ---
    B2 = 5
    x5 = jax.random.normal(kx2, (B2, C, F, T), dtype=jnp.float32)
    ref5 = _reference(x5, w1_t, b1[0], w2_t, b2[0])
    out5 = jax.block_until_ready(se_block_2d(x5, w1_t, b1, w2_t, b2, tb=2))
    assert jnp.allclose(out5, ref5, atol=1e-5, rtol=1e-5), "padded-batch mismatch"
    assert bool(jnp.isfinite(out5).all()), "NaN/Inf leaked from padded rows"

    # --- test 3: bf16 activations (half HBM traffic) + in-place aliasing ----
    x_bf = x5.astype(jnp.bfloat16)
    ref_bf = _reference(x_bf, w1_t, b1[0], w2_t, b2[0])
    out_bf = jax.block_until_ready(
        se_block_2d(x_bf, w1_t, b1, w2_t, b2, in_place=True))
    assert out_bf.dtype == jnp.bfloat16
    assert jnp.allclose(out_bf.astype(jnp.float32), ref_bf, atol=5e-2, rtol=5e-2), \
        "bf16 mismatch vs reference"

    print("KERNEL_OK")
</pallas_src>

<mosaic_0001>
module attributes {stable_mosaic.version = 11 : i64} {
  func.func @se_block_kernel(%arg0: i32, %arg1: memref<2x40x256xf32, #tpu.memory_space<vmem>>, %arg2: memref<40x5xf32, #tpu.memory_space<vmem>>, %arg3: memref<1x5xf32, #tpu.memory_space<vmem>>, %arg4: memref<5x40xf32, #tpu.memory_space<vmem>>, %arg5: memref<1x40xf32, #tpu.memory_space<vmem>>, %arg6: memref<2x40x256xf32, #tpu.memory_space<vmem>>) attributes {dimension_semantics = [#tpu.dimension_semantics<parallel>], iteration_bounds = array<i64: 1>, scalar_prefetch = 0 : i64, scratch_operands = 0 : i64, tpu.core_type = #tpu.core_type<tc>, window_params = [{transform_indices = @transform_0, window_bounds = array<i64: 2, 40, 256>}, {pipeline_mode = #tpu.pipeline_mode<synchronous>, transform_indices = @transform_1, window_bounds = array<i64: 40, 5>}, {pipeline_mode = #tpu.pipeline_mode<synchronous>, transform_indices = @transform_2, window_bounds = array<i64: 1, 5>}, {pipeline_mode = #tpu.pipeline_mode<synchronous>, transform_indices = @transform_3, window_bounds = array<i64: 5, 40>}, {pipeline_mode = #tpu.pipeline_mode<synchronous>, transform_indices = @transform_4, window_bounds = array<i64: 1, 40>}, {transform_indices = @transform_5, window_bounds = array<i64: 2, 40, 256>}]} {
    %c0 = arith.constant 0 : index
    %c0_0 = arith.constant 0 : index
    %c0_1 = arith.constant 0 : index
    %0 = vector.load %arg1[%c0, %c0_0, %c0_1] : memref<2x40x256xf32, #tpu.memory_space<vmem>>, vector<2x40x256xf32>
    %cst = arith.constant dense<0.000000e+00> : vector<2x40xf32>
    %1 = vector.multi_reduction <add>, %0, %cst [2] : vector<2x40x256xf32> to vector<2x40xf32>
    %cst_2 = arith.constant 2.560000e+02 : f32
    %2 = vector.broadcast %cst_2 : f32 to vector<2x40xf32>
    %3 = arith.divf %1, %2 : vector<2x40xf32>
    %c0_3 = arith.constant 0 : index
    %c0_4 = arith.constant 0 : index
    %4 = vector.load %arg2[%c0_3, %c0_4] : memref<40x5xf32, #tpu.memory_space<vmem>>, vector<40x5xf32>
    %cst_5 = arith.constant dense<0.000000e+00> : vector<2x5xf32>
    %5 = tpu.matmul %3, %4, %cst_5 {dimension_numbers = #tpu.dot_dimension_numbers<[1], [0], [0], [1], [0, 0, 1, 1], [], []>} : vector<2x40xf32>, vector<40x5xf32>, vector<2x5xf32> -> vector<2x5xf32>
    %c0_6 = arith.constant 0 : index
    %c0_7 = arith.constant 0 : index
    %6 = vector.load %arg3[%c0_6, %c0_7] : memref<1x5xf32, #tpu.memory_space<vmem>>, vector<1x5xf32>
    %7 = vector.broadcast %6 : vector<1x5xf32> to vector<2x5xf32>
    %8 = arith.addf %5, %7 : vector<2x5xf32>
    %cst_8 = arith.constant 0.000000e+00 : f32
    %9 = vector.broadcast %cst_8 : f32 to vector<2x5xf32>
    %10 = arith.maximumf %8, %9 : vector<2x5xf32>
    %c0_9 = arith.constant 0 : index
    %c0_10 = arith.constant 0 : index
    %11 = vector.load %arg4[%c0_9, %c0_10] : memref<5x40xf32, #tpu.memory_space<vmem>>, vector<5x40xf32>
    %cst_11 = arith.constant dense<0.000000e+00> : vector<2x40xf32>
    %12 = tpu.matmul %10, %11, %cst_11 {dimension_numbers = #tpu.dot_dimension_numbers<[1], [0], [0], [1], [0, 0, 1, 1], [], []>} : vector<2x5xf32>, vector<5x40xf32>, vector<2x40xf32> -> vector<2x40xf32>
    %c0_12 = arith.constant 0 : index
    %c0_13 = arith.constant 0 : index
    %13 = vector.load %arg5[%c0_12, %c0_13] : memref<1x40xf32, #tpu.memory_space<vmem>>, vector<1x40xf32>
    %14 = vector.broadcast %13 : vector<1x40xf32> to vector<2x40xf32>
    %15 = arith.addf %12, %14 : vector<2x40xf32>
    %16 = arith.negf %15 : vector<2x40xf32>
    %17 = math.exp %16 : vector<2x40xf32>
    %cst_14 = arith.constant 1.000000e+00 : f32
    %18 = vector.broadcast %cst_14 : f32 to vector<2x40xf32>
    %19 = arith.addf %18, %17 : vector<2x40xf32>
    %20 = arith.divf %18, %19 : vector<2x40xf32>
    %c0_15 = arith.constant 0 : index
    %c0_16 = arith.constant 0 : index
    %c0_17 = arith.constant 0 : index
    %21 = vector.load %arg1[%c0_15, %c0_16, %c0_17] : memref<2x40x256xf32, #tpu.memory_space<vmem>>, vector<2x40x256xf32>
    %22 = vector.shape_cast %20 : vector<2x40xf32> to vector<2x40x1xf32>
    %23 = vector.broadcast %22 : vector<2x40x1xf32> to vector<2x40x256xf32>
    %24 = arith.mulf %21, %23 : vector<2x40x256xf32>
    %c0_18 = arith.constant 0 : index
    %c0_19 = arith.constant 0 : index
    %c0_20 = arith.constant 0 : index
    %25 = vector.load %arg6[%c0_18, %c0_19, %c0_20] : memref<2x40x256xf32, #tpu.memory_space<vmem>>, vector<2x40x256xf32>
    tpu.vector_store %arg6[%c0_18, %c0_19, %c0_20], %24 {strides = array<i32>} : memref<2x40x256xf32, #tpu.memory_space<vmem>>, vector<2x40x256xf32>,
    return
  }
  func.func @transform_0(%arg0: i32) -> (i32, i32, i32) {
    %c0_i32 = arith.constant 0 : i32
    %c0_i32_0 = arith.constant 0 : i32
    %c0_i32_1 = arith.constant 0 : i32
    return %arg0, %c0_i32, %c0_i32_0 : i32, i32, i32
  }
  func.func @transform_1(%arg0: i32) -> (i32, i32) {
    %c0_i32 = arith.constant 0 : i32
    %c0_i32_0 = arith.constant 0 : i32
    %c0_i32_1 = arith.constant 0 : i32
    return %c0_i32, %c0_i32_0 : i32, i32
  }
  func.func @transform_2(%arg0: i32) -> (i32, i32) {
    %c0_i32 = arith.constant 0 : i32
    %c0_i32_0 = arith.constant 0 : i32
    %c0_i32_1 = arith.constant 0 : i32
    return %c0_i32, %c0_i32_0 : i32, i32
  }
  func.func @transform_3(%arg0: i32) -> (i32, i32) {
    %c0_i32 = arith.constant 0 : i32
    %c0_i32_0 = arith.constant 0 : i32
    %c0_i32_1 = arith.constant 0 : i32
    return %c0_i32, %c0_i32_0 : i32, i32
  }
  func.func @transform_4(%arg0: i32) -> (i32, i32) {
    %c0_i32 = arith.constant 0 : i32
    %c0_i32_0 = arith.constant 0 : i32
    %c0_i32_1 = arith.constant 0 : i32
    return %c0_i32, %c0_i32_0 : i32, i32
  }
  func.func @transform_5(%arg0: i32) -> (i32, i32, i32) {
    %c0_i32 = arith.constant 0 : i32
    %c0_i32_0 = arith.constant 0 : i32
    %c0_i32_1 = arith.constant 0 : i32
    return %arg0, %c0_i32, %c0_i32_0 : i32, i32, i32
  }
}

</mosaic_0001>

<bundles_post_ra>
// kernel: tpu_custom_call.1
= control target key start
LH: loop header
LB: loop body
LE: loop exit
PB: predicated region body
PF: predicated region fallthrough
CT: control target
= control target key end

     0   :  { %10 = vsyncpa [#allocation3], 0  ;;  %s726_s0 = inlined_call_operand.hbm [shape: f32[2,40,256], index: 0, kind: input, shape index: {}]   ;;  %s727_s1 = inlined_call_operand.vmem [shape: f32[40,5], index: 1, kind: input, shape index: {}]   ;;  %s728_s2 = inlined_call_operand.vmem [shape: f32[1,5], index: 2, kind: input, shape index: {}]   ;;  %s729_s3 = inlined_call_operand.vmem [shape: f32[5,40], index: 3, kind: input, shape index: {}]   ;;  %s730_s4 = inlined_call_operand.vmem [shape: f32[1,40], index: 4, kind: input, shape index: {}]   ;;  %s731_s5 = inlined_call_operand.hbm [shape: f32[2,40,256], index: 5, kind: output, shape index: {}]  }
   0x1   :  { %11 = vsyncpa [#allocation4], 0  ;;  %s544_s18 = smov [#allocation2]   ;;  %s496_s22 = scalar_lea.hbm %s726_s0, 2560 }
   0x2   :  { %s17_s19 = sshll.u32 %s544_s18, 4  ;;  %p497_p0 = scmp.ne.s32.totalorder %s726_s0, %s496_s22  ;;  %s18_s19 = int_to_ptr.vmem [resolvable:$true] %s17_s19 }
   0x3   :  { %p500_p1 = scmp.lt.u32.totalorder %s496_s22, %s726_s0 }
   0x5   :  { %p502_p2 = pnand %p500_p1, %p497_p0 }
   0x7   :  { %505 = shalt.err (!%p502_p2)
}
   0x8   :  { %s506_s27 = scalar_lea.vmem %s18_s19, 2560  ;;  %p511_p4 = scmp.lt.s32.totalorder %s18_s19, %s18_s19 }
   0x9   :  { %p507_p3 = scmp.ne.s32.totalorder %s18_s19, %s506_s27  ;;  %p512_p5 = scmp.lt.s32.totalorder %s506_s27, %s506_s27 }
   0xb   :  { %p513_p6 = por %p512_p5, %p511_p4 }
   0xd   :  { %p514_p7 = pnand %p513_p6, %p507_p3 }
   0xf   :  { %517 = shalt.err (!%p514_p7)
}
  0x10   :  { %s545_s28 = smov 256   ;;  %s546_s29 = smov 16  }
  0x11   :  { %23 = dma.hbm_to_vmem [thread:$0]  %s726_s0, 2560, %s18_s19, [#allocation3], %s545_s28, %s545_s28, %s546_s29  }
  0x12   :  { %540 = dma.done.wait [#allocation3], 2560  }
  0x13   :  { %541 = vsyncadd [#allocation3], 4294964736  ;;  %v596_v0 = vld [vmem:[#allocation2 + $0x50] sm:$0xff]  ;;  %v598_v1 = vld [vmem:[#allocation2 + $0x58] sm:$0xff]  ;;  %v547_v33 = vmov 0.0|0.0   ;;  %v548_v38 = vmov 0.0   ;;  %v118_v39 = vlaneseq }
  0x14   :  { %v600_v2 = vld [vmem:[#allocation2] sm:$0xff]  ;;  %v70_v3 = vadd.f32 %v598_v1, %v596_v0  ;;  %v604_v4 = vld [vmem:[#allocation2 + $0x8] sm:$0xff]  ;;  %v612_v8 = vld [vmem:[#allocation2 + $0x10] sm:$0xff]  ;;  %479 = vmatprep.subr.bf16.mxu0 %v547_v33  ;;  %vm549_vm0 = vmmov 0   ;;  %474 = vmatprep.subr.mxu1 %v548_v38  ;;  %vm129_vm1 = vcmask 130112   ;;  %vm136_vm2 = vcmask 195712  }
  0x15   :  { %v606_v5 = vld [vmem:[#allocation2 + $0x60] sm:$0xff]  ;;  %v608_v6 = vld [vmem:[#allocation2 + $0x68] sm:$0xff]  ;;  %v55_v7 = vadd.f32 %v604_v4, %v600_v2  ;;  %v614_v9 = vld [vmem:[#allocation2 + $0x18] sm:$0xff]  ;;  %471 = vmatprep.mubr.msk.f32.mxu0 %vm549_vm0, %v548_v38  ;;  %476 = vmatprep.mubr.msk.f32.mxu1 %vm549_vm0, %v548_v38  ;;  %v119_v42 = vand.u32 127, %v118_v39  ;;  %v671_v47 = vshrl.u32 %v118_v39, 7  ;;  %vm143_vm3 = vcmask 261312  }
  0x16   :  { %71 = vadd.xlane.f32.xlu1 %v70_v3  ;;  %v73_v10 = vadd.f32 %v608_v6, %v606_v5  ;;  %v58_v11 = vadd.f32 %v614_v9, %v612_v8  ;;  %v620_v12 = vld [vmem:[#allocation2 + $0x70] sm:$0xff]  ;;  %v622_v13 = vld [vmem:[#allocation2 + $0x78] sm:$0xff]  ;;  %v624_v14 = vld [vmem:[#allocation2 + $0x20] sm:$0xff]  ;;  %vm150_vm4 = vcmask 326912   ;;  %vm176_vm5 = vcmask 1041409  }
  0x17   :  { %56 = vadd.xlane.f32.xlu0 %v55_v7  ;;  %v626_v15 = vld [vmem:[#allocation2 + $0x28] sm:$0xff]  ;;  %v76_v16 = vadd.f32 %v622_v13, %v620_v12  ;;  %v632_v18 = vld [vmem:[#allocation2 + $0x80] sm:$0xff]  ;;  %v636_v20 = vld [vmem:[#allocation2 + $0x30] sm:$0xff]  ;;  %v124_v45 = vadd.s32 4294967288, %v119_v42  ;;  %v131_v46 = vadd.s32 4294967280, %v119_v42  ;;  %v138_v49 = vadd.s32 4294967272, %v119_v42 }
  0x18   :  { %v61_v17 = vadd.f32 %v626_v15, %v624_v14  ;;  %v634_v19 = vld [vmem:[#allocation2 + $0x88] sm:$0xff]  ;;  %v638_v21 = vld [vmem:[#allocation2 + $0x38] sm:$0xff]  ;;  %v644_v24 = vld [vmem:[#allocation2 + $0x90] sm:$0xff]  ;;  %v145_v56 = vadd.s32 4294967264, %v119_v42  ;;  %v122_v57 = vsub.s32 %v119_v42, %v671_v47  ;;  %vm178_vm6 = vcmask 326656  }
  0x19   :  { %v79_v22 = vadd.f32 %v634_v19, %v632_v18  ;;  %v64_v23 = vadd.f32 %v638_v21, %v636_v20  ;;  %v646_v25 = vld [vmem:[#allocation2 + $0x98] sm:$0xff]  ;;  %v648_v26 = vld [vmem:[#allocation2 + $0x40] sm:$0xff]  ;;  %v650_v27 = vld [vmem:[#allocation2 + $0x48] sm:$0xff]  ;;  %v127_v51 = vsub.s32 %v124_v45, %v671_v47  ;;  %v134_v54 = vsub.s32 %v131_v46, %v671_v47 }
  0x1a   :  { %74 = vadd.xlane.f32.xlu1 %v73_v10  ;;  %v82_v28 = vadd.f32 %v646_v25, %v644_v24  ;;  %v67_v29 = vadd.f32 %v650_v27, %v648_v26  ;;  %v96_v30 = vld [vmem:[%s727_s1] sm:$0xff]  ;;  %v97_v31 = vld [vmem:[%s727_s1 + $0x8] sm:$0xff]  ;;  %v98_v34 = vld [vmem:[%s727_s1 + $0x10] sm:$0xff]  ;;  %v141_v60 = vsub.s32 %v138_v49, %v671_v47  ;;  %vm264_vm7 = vcmask 1044480  }
  0x1b   :  { %59 = vadd.xlane.f32.xlu0 %v58_v11  ;;  %v480_v32 = vpack.c.bf16 %v97_v31, %v96_v30  ;;  %v99_v35 = vld [vmem:[%s727_s1 + $0x18] sm:$0xff]  ;;  %v100_v37 = vld [vmem:[%s727_s1 + $0x20] sm:$0xff]  ;;  %vm260_vm8 = vcmask 39936  }
  0x1c   :  { %v483_v36 = vpack.c.bf16 %v99_v35, %v98_v34  ;;  %v252_v46 = vld [vmem:[%s729_s3] sm:$0x1f] }
  0x1d   :  { %481 = vmatpush3.bf16.msra.mxu0 %v480_v32  ;;  %475 = vmatpush3.msk.msra.mxu1 %vm264_vm7, %v252_v46 }
  0x1e   :  { %77 = vadd.xlane.f32.xlu1 %v76_v16  ;;  %482 = vmatprep.subr.bf16.mxu0 %v547_v33 }
  0x1f   :  { %62 = vadd.xlane.f32.xlu0 %v61_v17  ;;  %v148_v17 = vsub.s32 %v145_v56, %v671_v47 }
  0x21   :  { %484 = vmatpush3.bf16.msra.mxu0 %v483_v36 }
  0x22   :  { %80 = vadd.xlane.f32.xlu1 %v79_v22  ;;  %469 = vmatprep.subr.mxu0 %v548_v38 }
  0x23   :  { %65 = vadd.xlane.f32.xlu0 %v64_v23 }
  0x25   :  { %470 = vmatpush3.msra.mxu0 %v100_v37 }
  0x26   :  { %83 = vadd.xlane.f32.xlu1 %v82_v28 }
  0x27   :  { %68 = vadd.xlane.f32.xlu0 %v67_v29 }
  0xa3   :  { %v72_v40 = vpop.xlane.xlu1 %71 }
  0xa4   :  { %v57_v41 = vpop.xlane.xlu0 %56  ;;  %v91_v58 = vmul.f32 0.00390625, %v72_v40 }
  0xa5   :  { %v86_v62 = vmul.f32 0.00390625, %v57_v41 }
  0xa6   :  { %v155_v22 = vrot.slane %v91_v58, %v122_v57 }
  0xa7   :  { %v75_v43 = vpop.xlane.xlu1 %74  ;;  %v123_v30 = vrot.slane %v86_v62, %v122_v57 }
  0xa8   :  { %v60_v44 = vpop.xlane.xlu0 %59  ;;  %v92_v52 = vmul.f32 0.00390625, %v75_v43 }
  0xa9   :  { %v87_v53 = vmul.f32 0.00390625, %v60_v44 }
  0xaa   :  { %v159_v7 = vrot.slane %v92_v52, %v127_v51 }
  0xab   :  { %v78_v48 = vpop.xlane.xlu1 %77  ;;  %v128_v11 = vrot.slane %v87_v53, %v127_v51  ;;  %v449_v53 = vld [vmem:[%s730_s4] ss:$0 sm:$0xff] }
  0xac   :  { %v63_v50 = vpop.xlane.xlu0 %62  ;;  %v93_v55 = vmul.f32 0.00390625, %v78_v48  ;;  %v160_v34 = vsel %vm129_vm1, %v159_v7, %v155_v22  ;;  %v447_v48 = vld [vmem:[%s728_s2] ss:$0 sm:$0xff]  ;;  %s550_s2 = smov [#allocation5]  }
  0xad   :  { %v88_v59 = vmul.f32 0.00390625, %v63_v50  ;;  %v130_v36 = vsel %vm129_vm1, %v128_v11, %v123_v30  ;;  %s435_s3 = sshll.u32 %s550_s2, 4  ;;  %s436_s3 = int_to_ptr.vmem [resolvable:$true] %s435_s3 }
  0xae   :  { %v164_v16 = vrot.slane %v93_v55, %v134_v54  ;;  %s518_s4 = scalar_lea.vmem %s436_s3, 2560  ;;  %p523_p9 = scmp.lt.s32.totalorder %s436_s3, %s436_s3 }
  0xaf   :  { %v81_v61 = vpop.xlane.xlu1 %80  ;;  %v135_v23 = vrot.slane %v88_v59, %v134_v54  ;;  %p519_p8 = scmp.ne.s32.totalorder %s436_s3, %s518_s4  ;;  %p524_p10 = scmp.lt.s32.totalorder %s518_s4, %s518_s4 }
  0xb0   :  { %v94_v63 = vmul.f32 0.00390625, %v81_v61  ;;  %v66_v3 = vpop.xlane.xlu0 %65  ;;  %v165_v37 = vsel %vm136_vm2, %v164_v16, %v160_v34 }
  0xb1   :  { %v89_v10 = vmul.f32 0.00390625, %v66_v3  ;;  %v137_v39 = vsel %vm136_vm2, %v135_v23, %v130_v36  ;;  %p525_p11 = por %p524_p10, %p523_p9 }
  0xb2   :  { %v169_v28 = vrot.slane %v94_v63, %v141_v60  ;;  %v369_v63 = vsub.s32 1, %v671_v47 }
  0xb3   :  { %v84_v29 = vpop.xlane.xlu1 %83  ;;  %v142_v31 = vrot.slane %v89_v10, %v141_v60  ;;  %v346_v60 = vsub.s32 0, %v671_v47  ;;  %p526_p12 = pnand %p525_p11, %p519_p8 }
  0xb4   :  { %v95_v32 = vmul.f32 0.00390625, %v84_v29  ;;  %v69_v33 = vpop.xlane.xlu0 %68  ;;  %v170_v40 = vsel %vm143_vm3, %v169_v28, %v165_v37 }
  0xb5   :  { %v90_v35 = vmul.f32 0.00390625, %v69_v33  ;;  %v144_v42 = vsel %vm143_vm3, %v142_v31, %v137_v39 }
  0xb6   :  { %v174_v38 = vrot.slane %v95_v32, %v148_v17 }
  0xb7   :  { %v149_v41 = vrot.slane %v90_v35, %v148_v17 }
  0xb8   :  { %v175_v43 = vsel %vm150_vm4, %v174_v38, %v170_v40 }
  0xb9   :  { %v151_v44 = vsel %vm150_vm4, %v149_v41, %v144_v42 }
  0xba   :  { %v177_v45 = vsel %vm176_vm5, %v175_v43, %v151_v44 }
  0xbb   :  { %472 = vmatmul.mubr.msk.f32.vlgmr.msra.gmra.mrb[0].mxu0 %vm178_vm6, %v177_v45 }
 0x18e   :  { %v247_v49 = vpop.f32.mrb[0].mxu0 }
 0x18f   :  { %v248_v50 = vadd.f32 %v447_v48, %v247_v49  ;;  %v473_v51 = vpop.f32.mrb[1].mxu0 }
 0x191   :  { %v251_v52 = vmax.f32 %v248_v50, 0.0 }
 0x193   :  { %477 = vmatmul.mubr.msk.f32.vlgmr.msra.gmra.mrb[0].mxu1 %vm260_vm8, %v251_v52 }
 0x266   :  { %v334_v54 = vpop.f32.mrb[0].mxu1 }
 0x267   :  { %v335_v55 = vadd.f32 %v449_v53, %v334_v54  ;;  %v478_v56 = vpop.f32.mrb[1].mxu1 }
 0x269   :  { %v452_v57 = vmul.f32 -1.442695, %v335_v55 }
 0x26b   :  { %492 = vpow2.f32 %v452_v57 }
 0x275   :  { %v493_v58 = vpop.eup %492 }
 0x276   :  { %v341_v59 = vadd.f32 1.0, %v493_v58 }
 0x278   :  { %494 = vrcp.f32 %v341_v59 }
 0x282   :  { %v495_v61 = vpop.eup %494 }
 0x283   :  { %v347_v62 = vrot.slane %v495_v61, %v346_v60  ;;  %v370_v3 = vrot.slane %v495_v61, %v369_v63 }
 0x285   :  { %353 = vbcast.lane.b32.xlu1 %v347_v62, 264  ;;  %349 = vbcast.lane.b32.xlu0 %v347_v62, 256 }
 0x289   :  { %357 = vbcast.lane.b32.xlu1 %v347_v62, 272  ;;  %365 = vbcast.lane.b32.xlu0 %v347_v62, 288 }
 0x28d   :  { %361 = vbcast.lane.b32.xlu1 %v347_v62, 280  ;;  %376 = vbcast.lane.b32.xlu0 %v370_v3, 264 }
 0x291   :  { %372 = vbcast.lane.b32.xlu1 %v370_v3, 256  ;;  %384 = vbcast.lane.b32.xlu0 %v370_v3, 280 }
 0x295   :  { %380 = vbcast.lane.b32.xlu1 %v370_v3, 272 }
 0x299   :  { %388 = vbcast.lane.b32.xlu1 %v370_v3, 288 }
 0x2f7   :  { %v354_v7 = vpop.permute.xlu1 %353  ;;  %v350_v10 = vpop.permute.xlu0 %349 }
 0x2f8   :  { %v392_v11 = vmul.f32 %v354_v7, %v612_v8  ;;  %v393_v16 = vmul.f32 %v354_v7, %v614_v9  ;;  %v390_v17 = vmul.f32 %v350_v10, %v600_v2  ;;  %v391_v22 = vmul.f32 %v350_v10, %v604_v4 }
 0x2fa   :  { %412 = vst [vmem:[#allocation5 + $0x10] sm:$0xff] %v392_v11  ;;  %413 = vst [vmem:[#allocation5 + $0x18] sm:$0xff] %v393_v16 }
 0x2fb   :  { %410 = vst [vmem:[#allocation5] sm:$0xff] %v390_v17  ;;  %411 = vst [vmem:[#allocation5 + $0x8] sm:$0xff] %v391_v22  ;;  %v358_v47 = vpop.permute.xlu1 %357  ;;  %v366_v23 = vpop.permute.xlu0 %365 }
 0x2fc   :  { %v394_v28 = vmul.f32 %v358_v47, %v624_v14  ;;  %v395_v29 = vmul.f32 %v358_v47, %v626_v15  ;;  %v398_v30 = vmul.f32 %v366_v23, %v648_v26  ;;  %v399_v8 = vmul.f32 %v366_v23, %v650_v27 }
 0x2fe   :  { %414 = vst [vmem:[#allocation5 + $0x20] sm:$0xff] %v394_v28  ;;  %415 = vst [vmem:[#allocation5 + $0x28] sm:$0xff] %v395_v29 }
 0x2ff   :  { %418 = vst [vmem:[#allocation5 + $0x40] sm:$0xff] %v398_v30  ;;  %419 = vst [vmem:[#allocation5 + $0x48] sm:$0xff] %v399_v8  ;;  %v362_v2 = vpop.permute.xlu1 %361  ;;  %v377_v4 = vpop.permute.xlu0 %376 }
 0x300   :  { %v396_v9 = vmul.f32 %v362_v2, %v636_v20  ;;  %v397_v31 = vmul.f32 %v362_v2, %v638_v21  ;;  %v402_v32 = vmul.f32 %v377_v4, %v606_v5  ;;  %v403_v14 = vmul.f32 %v377_v4, %v608_v6 }
 0x302   :  { %416 = vst [vmem:[#allocation5 + $0x30] sm:$0xff] %v396_v9  ;;  %417 = vst [vmem:[#allocation5 + $0x38] sm:$0xff] %v397_v31 }
 0x303   :  { %422 = vst [vmem:[#allocation5 + $0x60] sm:$0xff] %v402_v32  ;;  %423 = vst [vmem:[#allocation5 + $0x68] sm:$0xff] %v403_v14  ;;  %v373_v15 = vpop.permute.xlu1 %372  ;;  %v385_v26 = vpop.permute.xlu0 %384 }
 0x304   :  { %v400_v27 = vmul.f32 %v373_v15, %v596_v0  ;;  %v401_v33 = vmul.f32 %v373_v15, %v598_v1  ;;  %v406_v34 = vmul.f32 %v385_v26, %v632_v18  ;;  %v407_v20 = vmul.f32 %v385_v26, %v634_v19 }
 0x306   :  { %420 = vst [vmem:[#allocation5 + $0x50] sm:$0xff] %v400_v27  ;;  %421 = vst [vmem:[#allocation5 + $0x58] sm:$0xff] %v401_v33 }
 0x307   :  { %426 = vst [vmem:[#allocation5 + $0x80] sm:$0xff] %v406_v34  ;;  %427 = vst [vmem:[#allocation5 + $0x88] sm:$0xff] %v407_v20  ;;  %v381_v5 = vpop.permute.xlu1 %380 }
 0x308   :  { %v404_v6 = vmul.f32 %v381_v5, %v620_v12  ;;  %v405_v21 = vmul.f32 %v381_v5, %v622_v13 }
 0x30a   :  { %424 = vst [vmem:[#allocation5 + $0x70] sm:$0xff] %v404_v6  ;;  %425 = vst [vmem:[#allocation5 + $0x78] sm:$0xff] %v405_v21 }
 0x30b   :  { %v389_v0 = vpop.permute.xlu1 %388 }
 0x30c   :  { %v408_v1 = vmul.f32 %v389_v0, %v644_v24  ;;  %v409_v18 = vmul.f32 %v389_v0, %v646_v25 }
 0x30e   :  { %428 = vst [vmem:[#allocation5 + $0x90] sm:$0xff] %v408_v1  ;;  %429 = vst [vmem:[#allocation5 + $0x98] sm:$0xff] %v409_v18 }
 0x30f   :  { %529 = shalt.err (!%p526_p12)
}
 0x310   :  { %s530_s23 = scalar_lea.hbm %s731_s5, 2560 }
 0x311   :  { %p531_p13 = scmp.ne.s32.totalorder %s731_s5, %s530_s23  ;;  %p534_p0 = scmp.lt.u32.totalorder %s530_s23, %s731_s5 }
 0x313   :  { %p536_p1 = pnand %p534_p0, %p531_p13 }
 0x315   :  { %539 = shalt.err (!%p536_p1)
}
 0x316   :  { %441 = dma.vmem_to_hbm [thread:$0]  %s436_s3, 2560, %s731_s5, [#allocation4], %s545_s28, %s545_s28, %s546_s29  }
 0x317   :  { %542 = dma.done.wait [#allocation4], 2560  }
 0x318   :  { %543 = vsyncadd [#allocation4], 4294964736 }
 0x319   :  { %445 = vsyncpa [#allocation3], 1 }
 0x31a   :  { %446 = vsyncpa [#allocation4], 1 }

</bundles_post_ra>
